<compile_context>
chip_gen: v5e
topology: v5e:2x2
jax: 0.10.0
libtpu: 0.0.40
codegen_flags: <defaults>
</compile_context>

<pallas_src>
import jax
import jax.numpy as jnp
from jax.experimental import pallas as pl
from jax.experimental.pallas import tpu as pltpu

_LANES = 128          # TPU lane width: last dim of every block is 128-dense.
_MAX_BLOCK_ROWS = 1024  # 1024 x 128 f32 = 512 KiB per block (well inside VMEM,
                        # even with double-buffering on v7x's 64 MiB).


def _copy_kernel(x_ref, o_ref):
    # Identity: the reference forward performs no computation on its inputs.
    o_ref[...] = x_ref[...]


def _flatten_lane_dense(a):
    """Flatten to 2D with a 128-wide last dim when possible (lane-dense)."""
    total = a.size
    if total % _LANES == 0:
        return a.reshape(total // _LANES, _LANES)
    # Fallback: single row covering the whole array (block == full dims).
    return a.reshape(1, total)


def _device_identity(a):
    """Lane-dense, large-tile identity copy on TPU with output aliased to input."""
    a2 = _flatten_lane_dense(a)
    rows, lanes = a2.shape
    block_rows = rows if rows <= _MAX_BLOCK_ROWS else _MAX_BLOCK_ROWS
    grid = (pl.cdiv(rows, block_rows),)

    out = pl.pallas_call(
        _copy_kernel,
        out_shape=jax.ShapeDtypeStruct(a2.shape, a2.dtype),
        grid=grid,
        in_specs=[pl.BlockSpec((block_rows, lanes), lambda i: (i, 0))],
        out_specs=pl.BlockSpec((block_rows, lanes), lambda i: (i, 0)),
        input_output_aliases={0: 0},
        compiler_params=pltpu.CompilerParams(
            dimension_semantics=("parallel",)
        ),
    )(a2)
    return out.reshape(a.shape)


class SketchyDecoderFree:
    """JAX/Pallas port of the PyTorch SketchyDecoderFree wrapper."""

    def __init__(self, skdec=None, debug_run_kernel=False):
        # The PyTorch __init__ only stores the wrapped decoder; no parameters.
        self.d = skdec
        self._debug_run_kernel = debug_run_kernel

    def forward(self, ctx, x):
        # Reference forward is `pass` -> returns None.  The dead identity
        # kernel is NOT run by default (its outputs are discarded, so running
        # it would only burn HBM bandwidth); enable only for debugging.
        if self._debug_run_kernel:
            _device_identity(ctx)
            _device_identity(x)
        return None

    __call__ = forward


if __name__ == "__main__":
    key = jax.random.PRNGKey(0)
    k_ctx, k_x = jax.random.split(key)

    B, S_CTX, S_X, H = 2, 8, 8, 32
    ctx = jax.random.normal(k_ctx, (B, S_CTX, H), dtype=jnp.float32)
    x = jax.random.normal(k_x, (B, S_X, H), dtype=jnp.float32)

    # Exercise the Pallas kernel once directly and verify exact pass-through.
    ctx_out = _device_identity(ctx)
    x_out = _device_identity(x)
    jax.block_until_ready(ctx_out)
    jax.block_until_ready(x_out)
    assert jnp.array_equal(ctx_out, ctx)
    assert jnp.array_equal(x_out, x)

    # Module wrapper: returns None, matching the PyTorch reference, and does
    # not launch any device work by default.
    mod = SketchyDecoderFree(skdec=None)
    result = mod(ctx, x)
    assert result is None

    print("KERNEL_OK")
</pallas_src>

<mosaic_0001>
module attributes {stable_mosaic.version = 11 : i64} {
  func.func @_copy_kernel(%arg0: i32, %arg1: memref<4x128xf32, #tpu.memory_space<vmem>>, %arg2: memref<4x128xf32, #tpu.memory_space<vmem>>) attributes {dimension_semantics = [#tpu.dimension_semantics<parallel>], iteration_bounds = array<i64: 1>, scalar_prefetch = 0 : i64, scratch_operands = 0 : i64, tpu.core_type = #tpu.core_type<tc>, window_params = [{transform_indices = @transform_0, window_bounds = array<i64: 4, 128>}, {transform_indices = @transform_1, window_bounds = array<i64: 4, 128>}]} {
    %c0 = arith.constant 0 : index
    %c0_0 = arith.constant 0 : index
    %0 = vector.load %arg1[%c0, %c0_0] : memref<4x128xf32, #tpu.memory_space<vmem>>, vector<4x128xf32>
    %c0_1 = arith.constant 0 : index
    %c0_2 = arith.constant 0 : index
    %1 = vector.load %arg2[%c0_1, %c0_2] : memref<4x128xf32, #tpu.memory_space<vmem>>, vector<4x128xf32>
    tpu.vector_store %arg2[%c0_1, %c0_2], %0 {strides = array<i32>} : memref<4x128xf32, #tpu.memory_space<vmem>>, vector<4x128xf32>,
    return
  }
  func.func @transform_0(%arg0: i32) -> (i32, i32) {
    %c0_i32 = arith.constant 0 : i32
    %c0_i32_0 = arith.constant 0 : i32
    return %arg0, %c0_i32 : i32, i32
  }
  func.func @transform_1(%arg0: i32) -> (i32, i32) {
    %c0_i32 = arith.constant 0 : i32
    %c0_i32_0 = arith.constant 0 : i32
    return %arg0, %c0_i32 : i32, i32
  }
}

</mosaic_0001>

<bundles_post_ra>
// kernel: tpu_custom_call.1
= control target key start
LH: loop header
LB: loop body
LE: loop exit
PB: predicated region body
PF: predicated region fallthrough
CT: control target
= control target key end

     0   :  { %6 = vsyncpa [#allocation3], 0  ;;  %s114_s0 = inlined_call_operand.hbm [shape: f32[4,128], index: 0, kind: input, shape index: {}, may-alias: {0,1}]   ;;  %s115_s1 = inlined_call_operand.hbm [shape: f32[4,128], index: 1, kind: output, shape index: {}, may-alias: {0,1}]  }
   0x1   :  { %7 = vsyncpa [#allocation4], 0  ;;  %s13_s8 = sshll.u32 %s114_s0, 4  ;;  %s96_s9 = smov [#allocation2]   ;;  %s14_s8 = int_to_ptr.hbm [resolvable:$true] %s13_s8 }
   0x2   :  { %s15_s10 = sshll.u32 %s96_s9, 4  ;;  %s16_s10 = int_to_ptr.vmem [resolvable:$true] %s15_s10 }
   0x3   :  { %18 = dma.hbm_to_vmem [thread:$0]  %s14_s8, 64, %s16_s10, [#allocation3]  }
   0x4   :  { %92 = dma.done.wait [#allocation3], 64  }
   0x5   :  { %93 = vsyncadd [#allocation3], 4294967232  ;;  %s97_s11 = smov [#allocation5]   ;;  %s32_s15 = sshll.u32 %s115_s1, 4  ;;  %v23_v0 = vld [vmem:[#allocation2] sm:$0xf]  ;;  %s33_s15 = int_to_ptr.hbm [resolvable:$true] %s32_s15 }
   0x6   :  { %s30_s12 = sshll.u32 %s97_s11, 4  ;;  %24 = vst [vmem:[#allocation5] sm:$0xf] %v23_v0  ;;  %s31_s12 = int_to_ptr.vmem [resolvable:$true] %s30_s12 }
   0x7   :  { %35 = dma.vmem_to_hbm [thread:$0]  %s31_s12, 64, %s33_s15, [#allocation4]  }
   0x8   :  { %94 = dma.done.wait [#allocation4], 64  }
   0x9   :  { %95 = vsyncadd [#allocation4], 4294967232 }
   0xa   :  { %40 = vsyncpa [#allocation3], 1 }
   0xb   :  { %41 = vsyncpa [#allocation4], 1 }

</bundles_post_ra>
